<compile_context>
chip_gen: v7x
topology: tpu7x:2x2x1
jax: 0.10.0
libtpu: 0.0.40
codegen_flags: <defaults>
</compile_context>

<pallas_src>
import functools

import jax
import jax.numpy as jnp
from jax.experimental import pallas as pl
from jax.experimental.pallas import tpu as pltpu

NUM_FEATURES = 1024   # swin_base_patch4_window7_224 num_features
HIDDEN = 128          # l0 output dim
META_DIM = 12         # len(CFG.FEATURE_COLS)
TARGET_DIM = 1        # CFG.TARGET_DIM
META_PAD = 128        # lane-dense metas/tail slab: [0:12]=metas, [12]=1 (or c)
OUT_LANES = 8         # small output slab; wrapper slices lane 0
TILE_B = 1024         # batch tile for large (serving) batches; 512-2048 range


def _head_kernel(feat_ref, metas_ref, wc_ref, wt_ref, out_ref):
    """out[b] = sum_k feat[b,k]*w_comb[k] + sum_j metas_pad[b,j]*w_tail[j]."""
    # Upcast to f32 before the reduce (bf16 inputs OK; never accumulate in bf16).
    feat = feat_ref[...].astype(jnp.float32)                  # (tb, 1024)
    wc = wc_ref[...].astype(jnp.float32)                      # (1, 1024)
    acc = jnp.sum(feat * wc, axis=-1, keepdims=True)          # (tb, 1)
    tail = metas_ref[...].astype(jnp.float32) * wt_ref[...].astype(jnp.float32)
    acc = acc + jnp.sum(tail, axis=-1, keepdims=True)         # + metas⋅w_meta + c
    # Broadcast across the small output slab (wrapper slices column 0).
    out_ref[...] = jnp.broadcast_to(acc, out_ref.shape).astype(out_ref.dtype)


def prepare_head_params(w_l0, b_l0, w_fc, b_fc):
    """One-time (weight-load time) algebraic collapse of l0 + fc.

    w_l0: (128, 1024)  b_l0: (128,)  w_fc: (1, 140)  b_fc: (1,)
    (PyTorch nn.Linear layouts.)  Returns (w_comb (1,1024), w_tail (1,128)).
    """
    wfx = w_fc[:, :HIDDEN].astype(jnp.float32)                       # (1, 128)
    w_comb = wfx @ w_l0.astype(jnp.float32)                          # (1, 1024)
    w_meta = w_fc[:, HIDDEN:].astype(jnp.float32)                    # (1, 12)
    c = (b_l0[None, :].astype(jnp.float32) @ wfx.T
         + b_fc[None, :].astype(jnp.float32))                        # (1, 1)
    # Fold w_meta and c into one lane-dense tail constant:
    #   lanes [0:12] = w_meta, lane 12 = c (pairs with the "1" lane in metas_pad).
    w_tail = jnp.zeros((1, META_PAD), jnp.float32)
    w_tail = w_tail.at[:, :META_DIM].set(w_meta)
    w_tail = w_tail.at[:, META_DIM].set(c[0, 0])
    return w_comb, w_tail


@jax.jit
def pet2_head(feat, metas, w_comb, w_tail):
    """feat: (B, NUM_FEATURES), metas: (B, META_DIM) -> (B, TARGET_DIM) f32."""
    B = feat.shape[0]

    # Lane-dense metas slab with the bias "1" folded into lane 12.
    metas_pad = jnp.zeros((B, META_PAD), jnp.float32)
    metas_pad = metas_pad.at[:, :META_DIM].set(metas.astype(jnp.float32))
    metas_pad = metas_pad.at[:, META_DIM].set(1.0)

    # Batch tiling: single full-batch tile at small B, TILE_B tiles otherwise.
    if B > TILE_B:
        tb = TILE_B
        pb = pl.cdiv(B, tb) * tb
        if pb != B:
            feat = jnp.pad(feat, ((0, pb - B), (0, 0)))
            metas_pad = jnp.pad(metas_pad, ((0, pb - B), (0, 0)))
    else:
        tb, pb = B, B

    flops = 2 * pb * (NUM_FEATURES + META_PAD)
    bytes_accessed = (pb * NUM_FEATURES * feat.dtype.itemsize
                      + pb * META_PAD * 4
                      + NUM_FEATURES * w_comb.dtype.itemsize
                      + META_PAD * 4
                      + pb * OUT_LANES * 4)

    out_pad = pl.pallas_call(
        _head_kernel,
        out_shape=jax.ShapeDtypeStruct((pb, OUT_LANES), jnp.float32),
        grid=(pb // tb,),
        in_specs=[
            pl.BlockSpec((tb, NUM_FEATURES), lambda i: (i, 0)),   # feat tile
            pl.BlockSpec((tb, META_PAD), lambda i: (i, 0)),       # metas tile
            pl.BlockSpec((1, NUM_FEATURES), lambda i: (0, 0)),    # resident weight
            pl.BlockSpec((1, META_PAD), lambda i: (0, 0)),        # resident tail
        ],
        out_specs=pl.BlockSpec((tb, OUT_LANES), lambda i: (i, 0)),
        compiler_params=pltpu.CompilerParams(
            dimension_semantics=("parallel",),
            allow_input_fusion=[True, True, True, True],
        ),
        cost_estimate=pl.CostEstimate(
            flops=flops, transcendentals=0, bytes_accessed=bytes_accessed),
    )(feat, metas_pad, w_comb, w_tail)

    return out_pad[:B, :TARGET_DIM]


def _reference(feat, metas, w_l0, b_l0, w_fc, b_fc):
    x = feat @ w_l0.T + b_l0                        # dropout identity (eval)
    xc = jnp.concatenate([x, metas], axis=1)
    return xc @ w_fc.T + b_fc


if __name__ == "__main__":
    key = jax.random.PRNGKey(0)
    k1, k2, k3, k4, k5, k6 = jax.random.split(key, 6)

    B = 2
    feat = jax.random.normal(k1, (B, NUM_FEATURES), dtype=jnp.float32)
    metas = jax.random.uniform(k2, (B, META_DIM), dtype=jnp.float32)

    # Deterministic synthetic parameters (shapes from Pet2Model.__init__).
    w_l0 = jax.random.normal(k3, (HIDDEN, NUM_FEATURES), jnp.float32) * 0.02
    b_l0 = jax.random.normal(k4, (HIDDEN,), jnp.float32) * 0.02
    w_fc = jax.random.normal(k5, (TARGET_DIM, HIDDEN + META_DIM), jnp.float32) * 0.02
    b_fc = jax.random.normal(k6, (TARGET_DIM,), jnp.float32) * 0.02

    # Weight preprocessing hoisted out of the per-call path (done once).
    w_comb, w_tail = prepare_head_params(w_l0, b_l0, w_fc, b_fc)
    w_comb = jax.block_until_ready(w_comb)
    w_tail = jax.block_until_ready(w_tail)

    out = pet2_head(feat, metas, w_comb, w_tail)
    out = jax.block_until_ready(out)

    ref = _reference(feat, metas, w_l0, b_l0, w_fc, b_fc)
    assert out.shape == (B, TARGET_DIM)
    assert jnp.allclose(out, ref, atol=1e-4, rtol=1e-4), (out, ref)
    print("KERNEL_OK")
</pallas_src>

<mosaic_0001>
module attributes {stable_mosaic.version = 11 : i64} {
  func.func @_head_kernel(%arg0: i32, %arg1: memref<2x1024xf32, #tpu.memory_space<vmem>>, %arg2: memref<2x128xf32, #tpu.memory_space<vmem>>, %arg3: memref<1x1024xf32, #tpu.memory_space<vmem>>, %arg4: memref<1x128xf32, #tpu.memory_space<vmem>>, %arg5: memref<2x8xf32, #tpu.memory_space<vmem>>) attributes {dimension_semantics = [#tpu.dimension_semantics<parallel>], iteration_bounds = array<i64: 1>, scalar_prefetch = 0 : i64, scratch_operands = 0 : i64, tpu.core_type = #tpu.core_type<tc>, window_params = [{transform_indices = @transform_0, window_bounds = array<i64: 2, 1024>}, {transform_indices = @transform_1, window_bounds = array<i64: 2, 128>}, {pipeline_mode = #tpu.pipeline_mode<synchronous>, transform_indices = @transform_2, window_bounds = array<i64: 1, 1024>}, {pipeline_mode = #tpu.pipeline_mode<synchronous>, transform_indices = @transform_3, window_bounds = array<i64: 1, 128>}, {transform_indices = @transform_4, window_bounds = array<i64: 2, 8>}]} {
    %c0 = arith.constant 0 : index
    %c0_0 = arith.constant 0 : index
    %0 = vector.load %arg1[%c0, %c0_0] : memref<2x1024xf32, #tpu.memory_space<vmem>>, vector<2x1024xf32>
    %c0_1 = arith.constant 0 : index
    %c0_2 = arith.constant 0 : index
    %1 = vector.load %arg3[%c0_1, %c0_2] : memref<1x1024xf32, #tpu.memory_space<vmem>>, vector<1x1024xf32>
    %2 = vector.broadcast %1 : vector<1x1024xf32> to vector<2x1024xf32>
    %3 = arith.mulf %0, %2 : vector<2x1024xf32>
    %cst = arith.constant dense<0.000000e+00> : vector<2xf32>
    %4 = vector.multi_reduction <add>, %3, %cst [1] : vector<2x1024xf32> to vector<2xf32>
    %5 = vector.shape_cast %4 : vector<2xf32> to vector<2x1xf32>
    %c0_3 = arith.constant 0 : index
    %c0_4 = arith.constant 0 : index
    %6 = vector.load %arg2[%c0_3, %c0_4] : memref<2x128xf32, #tpu.memory_space<vmem>>, vector<2x128xf32>
    %c0_5 = arith.constant 0 : index
    %c0_6 = arith.constant 0 : index
    %7 = vector.load %arg4[%c0_5, %c0_6] : memref<1x128xf32, #tpu.memory_space<vmem>>, vector<1x128xf32>
    %8 = vector.broadcast %7 : vector<1x128xf32> to vector<2x128xf32>
    %9 = arith.mulf %6, %8 : vector<2x128xf32>
    %cst_7 = arith.constant dense<0.000000e+00> : vector<2xf32>
    %10 = vector.multi_reduction <add>, %9, %cst_7 [1] : vector<2x128xf32> to vector<2xf32>
    %11 = vector.shape_cast %10 : vector<2xf32> to vector<2x1xf32>
    %12 = arith.addf %5, %11 : vector<2x1xf32>
    %13 = vector.shape_cast %12 : vector<2x1xf32> to vector<2x1xf32>
    %14 = vector.broadcast %13 : vector<2x1xf32> to vector<2x8xf32>
    %c0_8 = arith.constant 0 : index
    %c0_9 = arith.constant 0 : index
    %15 = vector.load %arg5[%c0_8, %c0_9] : memref<2x8xf32, #tpu.memory_space<vmem>>, vector<2x8xf32>
    tpu.vector_store %arg5[%c0_8, %c0_9], %14 {strides = array<i32>} : memref<2x8xf32, #tpu.memory_space<vmem>>, vector<2x8xf32>,
    return
  }
  func.func @transform_0(%arg0: i32) -> (i32, i32) {
    %c0_i32 = arith.constant 0 : i32
    %c0_i32_0 = arith.constant 0 : i32
    return %arg0, %c0_i32 : i32, i32
  }
  func.func @transform_1(%arg0: i32) -> (i32, i32) {
    %c0_i32 = arith.constant 0 : i32
    %c0_i32_0 = arith.constant 0 : i32
    return %arg0, %c0_i32 : i32, i32
  }
  func.func @transform_2(%arg0: i32) -> (i32, i32) {
    %c0_i32 = arith.constant 0 : i32
    %c0_i32_0 = arith.constant 0 : i32
    %c0_i32_1 = arith.constant 0 : i32
    return %c0_i32, %c0_i32_0 : i32, i32
  }
  func.func @transform_3(%arg0: i32) -> (i32, i32) {
    %c0_i32 = arith.constant 0 : i32
    %c0_i32_0 = arith.constant 0 : i32
    %c0_i32_1 = arith.constant 0 : i32
    return %c0_i32, %c0_i32_0 : i32, i32
  }
  func.func @transform_4(%arg0: i32) -> (i32, i32) {
    %c0_i32 = arith.constant 0 : i32
    %c0_i32_0 = arith.constant 0 : i32
    return %arg0, %c0_i32 : i32, i32
  }
}

</mosaic_0001>

<bundles_post_ra>
// kernel: pet2_head.1
= control target key start
LH: loop header
LB: loop body
LE: loop exit
PB: predicated region body
PF: predicated region fallthrough
CT: control target
= control target key end

     0   :  { %v21_v0 = vlaneseq  ;;  %v174_v1 = vmov 1983009808   ;;  %vm135_vm0 = vcmask 1041408   ;;  %vm166_vm1 = vcmask 58368   ;;  %s227_s2 = inlined_call_operand.vmem [shape: f32[1,1024], index: 2, kind: input, shape index: {}]   ;;  %s228_s0 = inlined_call_operand.vmem [shape: f32[2,1024], index: 0, kind: input, shape index: {}]   ;;  %s229_s1 = inlined_call_operand.vmem [shape: f32[2,128], index: 1, kind: input, shape index: {}]   ;;  %s230_s3 = inlined_call_operand.vmem [shape: f32[1,128], index: 3, kind: input, shape index: {}]   ;;  %s231_s4 = inlined_call_operand.vmem [shape: f32[2,8], index: 4, kind: output, shape index: {}]  }
   0x1   :  { %v56_v2 = vunpack.c.l.s4 %v174_v1  ;;  %v19_v4 = vld [vmem:[%s227_s2] sm:$0xff]  ;;  %v18_v32 = vld [vmem:[%s228_s0 + $0x8] sm:$0xff] }
   0x2   :  { %v22_v3 = vshrl.u32 %v21_v0, 7  ;;  %v17_v29 = vld [vmem:[%s228_s0] sm:$0xff] }
   0x3   :  { %v57_v5 = vunpack.c.0.s8 %v56_v2  ;;  %v153_v59 = vld [vmem:[%s229_s1] sm:$0x3] }
   0x4   :  { %v23_v6 = vsub.s32 0, %v22_v3  ;;  %v27_v7 = vsub.s32 1, %v22_v3  ;;  %v31_v8 = vsub.s32 2, %v22_v3  ;;  %v35_v9 = vsub.s32 3, %v22_v3  ;;  %v172_v60 = vld [vmem:[%s230_s3] ss:$0 sm:$0xff] }
   0x5   :  { %v39_v10 = vsub.s32 4, %v22_v3  ;;  %v43_v11 = vsub.s32 5, %v22_v3  ;;  %v47_v12 = vsub.s32 6, %v22_v3  ;;  %v51_v13 = vsub.s32 7, %v22_v3 }
   0x6   :  { %v24_v14 = vrot.slane %v19_v4, %v23_v6  ;;  %v28_v15 = vrot.slane %v19_v4, %v27_v7  ;;  %v32_v16 = vrot.slane %v19_v4, %v31_v8  ;;  %v36_v17 = vrot.slane %v19_v4, %v35_v9 }
   0x7   :  { %v40_v18 = vrot.slane %v19_v4, %v39_v10  ;;  %v44_v19 = vrot.slane %v19_v4, %v43_v11  ;;  %v48_v20 = vrot.slane %v19_v4, %v47_v12  ;;  %v52_v21 = vrot.slane %v19_v4, %v51_v13 }
   0x8   :  { %v53_v22 = vcombine.low %v24_v14, %v28_v15  ;;  %v54_v23 = vcombine.low %v32_v16, %v36_v17  ;;  %v60_v24 = vsub.s32 %v57_v5, %v22_v3  ;;  %v161_v63 = vmul.f32 %v172_v60, %v153_v59 }
   0x9   :  { %v70_v25 = vcombine.low %v40_v18, %v44_v19  ;;  %v71_v26 = vcombine.low %v48_v20, %v52_v21 }
   0xa   :  { %v61_v27 = vrot.slane %v53_v22, %v60_v24  ;;  %v68_v28 = vrot.slane %v54_v23, %v60_v24  ;;  %v162_v1 = vsel %vm135_vm0, %v161_v63, 0.0 }
   0xb   :  { %v78_v30 = vrot.slane %v70_v25, %v60_v24  ;;  %v85_v31 = vrot.slane %v71_v26, %v60_v24 }
   0xc   :  { %v69_v33 = vcombine.low %v61_v27, %v68_v28 }
   0xd   :  { %v86_v34 = vcombine.low %v78_v30, %v85_v31 }
   0xe   :  { %v89_v35 = vmul.f32 %v69_v33, %v17_v29 }
   0xf   :  { %v90_v36 = vmul.f32 %v86_v34, %v18_v32 }
  0x10   :  { %v93_v37 = vcombine.high %v89_v35, %v89_v35  ;;  %v100_v38 = vrot.slane %v89_v35, %v60_v24 }
  0x11   :  { %v110_v39 = vcombine.high %v90_v36, %v90_v36  ;;  %v117_v42 = vrot.slane %v90_v36, %v60_v24 }
  0x12   :  { %v107_v40 = vrot.slane %v93_v37, %v60_v24  ;;  %v108_v41 = vcombine.high %v100_v38, %v100_v38  ;;  %v136_v43 = vsel %vm135_vm0, %v100_v38, 0.0 }
  0x13   :  { %v124_v48 = vrot.slane %v110_v39, %v60_v24  ;;  %v125_v49 = vcombine.high %v117_v42, %v117_v42  ;;  %v143_v52 = vsel %vm135_vm0, %v117_v42, 0.0 }
  0x14   :  { %v109_v44 = vcombine.high %v107_v40, %v107_v40  ;;  %v137_v45 = vsel %vm135_vm0, %v108_v41, 0.0  ;;  %v139_v46 = vsel %vm135_vm0, %v107_v40, 0.0 }
  0x15   :  { %v138_v47 = vadd.f32 %v137_v45, %v136_v43  ;;  %v126_v54 = vcombine.high %v124_v48, %v124_v48  ;;  %v145_v55 = vsel %vm135_vm0, %v125_v49, 0.0  ;;  %v147_v57 = vsel %vm135_vm0, %v124_v48, 0.0 }
  0x16   :  { %v141_v50 = vsel %vm135_vm0, %v109_v44, 0.0 }
  0x17   :  { %v140_v51 = vadd.f32 %v139_v46, %v138_v47  ;;  %v149_v61 = vsel %vm135_vm0, %v126_v54, 0.0 }
  0x19   :  { %v142_v53 = vadd.f32 %v141_v50, %v140_v51 }
  0x1b   :  { %v144_v56 = vadd.f32 %v143_v52, %v142_v53 }
  0x1d   :  { %v146_v58 = vadd.f32 %v145_v55, %v144_v56 }
  0x1f   :  { %v148_v62 = vadd.f32 %v147_v57, %v146_v58 }
  0x21   :  { %v150_v0 = vadd.f32 %v149_v61, %v148_v62 }
  0x23   :  { %151 = vadd.xlane.f32.xlu0 %v150_v0 }
  0x27   :  { %163 = vadd.xlane.f32.xlu0 %v162_v1 }
  0xb0   :  { %v152_v2 = vpop.xlane.xlu0 %151 }
  0xb4   :  { %v164_v3 = vpop.xlane.xlu0 %163 }
  0xb5   :  { %v165_v4 = vadd.f32 %v164_v3, %v152_v2 }
  0xb7   :  { %167 = vst.msk [vmem:[%s231_s4] sm:$0x3] %vm166_vm1, %v165_v4 }

</bundles_post_ra>
